<compile_context>
chip_gen: v6e
topology: v6e:2x2x1
jax: 0.10.0
libtpu: 0.0.40
codegen_flags: <defaults>
</compile_context>

<pallas_src>
import functools

import jax
import jax.numpy as jnp
from jax import lax
from jax.experimental import pallas as pl
from jax.experimental.pallas import tpu as pltpu


_CHUNK = 128  # packed rows per inner compute step (= 512 batch rows at d_in=32)


def _round_up(a, m):
    return ((a + m - 1) // m) * m


def _cdiv(a, b):
    return (a + b - 1) // b


def _mlp_readout_kernel(xp_ref, w0_ref, b0_ref, w1_ref, b1_ref, w2_ref,
                        b2_ref, op_ref, *, n_chunks):
    # Tiny, VMEM-resident weights/biases: load once per grid step.
    w0 = w0_ref[...]
    b0 = b0_ref[...]
    w1 = w1_ref[...]
    b1 = b1_ref[...]
    w2 = w2_ref[...]
    b2 = b2_ref[...]

    def body(c, carry):
        off = pl.multiple_of(c * _CHUNK, _CHUNK)
        xc = xp_ref[pl.ds(off, _CHUNK), :]                    # [128, P*d_in]
        h = jnp.dot(xc, w0, preferred_element_type=jnp.float32) + b0
        h = jnp.maximum(h, 0.0)                               # [128, P*h1]
        h = jnp.dot(h, w1, preferred_element_type=jnp.float32) + b1
        h = jnp.maximum(h, 0.0)                               # [128, P*h2]
        y = jnp.dot(h, w2, preferred_element_type=jnp.float32) + b2
        op_ref[pl.ds(off, _CHUNK), :] = y.astype(op_ref.dtype)  # [128, P*d_out]
        return carry

    lax.fori_loop(0, n_chunks, body, 0, unroll=True)


def _block_diag(w, p):
    """kron(I_p, w): block-diagonal expansion so packed rows stay independent."""
    if p == 1:
        return w
    return jnp.kron(jnp.eye(p, dtype=w.dtype), w)


def mlp_readout(x, params, *, tile_bytes=2 << 20):
    """Fused 3-layer MLP readout.

    x:       [N, input_dim] float32
    params:  ((w0, b0), (w1, b1), (w2, b2)), w_l: (in_l, out_l), b_l: (1, out_l)
    tile_bytes: x bytes DMA'd per grid step (~2 MiB default; v6e/v7x may go
             4-8 MiB — raise vmem_limit_bytes beyond v5e's 16 MiB scoped default).
    """
    (w0, b0), (w1, b1), (w2, b2) = params
    N, d_in = x.shape
    d_out = w2.shape[1]

    # Lane-packing factor: how many batch rows fit in one 128-lane row.
    p = 128 // d_in if (d_in <= 128 and 128 % d_in == 0) else 1

    n_rows = _round_up(max(N, 1), p)
    if n_rows != N:
        # Only when N % p != 0 (<= p-1 rows of zero padding, one extra copy).
        x = jnp.pad(x, ((0, n_rows - N), (0, 0)))
    n_packed = n_rows // p
    xp = x.reshape(n_packed, p * d_in)      # contiguous reshape: no data movement

    # Block-diagonal weights / lane-tiled biases (tiny, built once).
    w0b, w1b, w2b = _block_diag(w0, p), _block_diag(w1, p), _block_diag(w2, p)
    b0b = jnp.tile(b0, (1, p))
    b1b = jnp.tile(b1, (1, p))
    b2b = jnp.tile(b2, (1, p))

    lw_in = p * d_in
    lw_out = p * d_out

    # Packed-row tile (DMA granularity). VMEM rows are lane-padded to 128,
    # so budget with the padded width.
    row_bytes = _round_up(lw_in, 128) * x.dtype.itemsize
    tile = max(_CHUNK, _round_up(tile_bytes // row_bytes, _CHUNK))
    tile = min(tile, _round_up(n_packed, _CHUNK))       # don't exceed the work
    if n_packed > 2 * _CHUNK:
        # Keep >= 2 grid steps so v7x's two TensorCores both stream.
        tile = min(tile, _round_up(_cdiv(n_packed, 2), _CHUNK))
    tile = max(tile, _CHUNK)

    grid = (_cdiv(n_packed, tile),)
    n_chunks = tile // _CHUNK

    def _const(a):
        # Whole-array resident block (weights/biases): constant index_map.
        return pl.BlockSpec(a.shape, lambda i: (0, 0))

    kernel = functools.partial(_mlp_readout_kernel, n_chunks=n_chunks)

    out_packed = pl.pallas_call(
        kernel,
        out_shape=jax.ShapeDtypeStruct((n_packed, lw_out), x.dtype),
        grid_spec=pltpu.PrefetchScalarGridSpec(
            num_scalar_prefetch=0,
            grid=grid,
            in_specs=[
                pl.BlockSpec((tile, lw_in), lambda i: (i, 0)),   # packed x tile
                _const(w0b), _const(b0b),
                _const(w1b), _const(b1b),
                _const(w2b), _const(b2b),
            ],
            out_specs=pl.BlockSpec((tile, lw_out), lambda i: (i, 0)),
        ),
        compiler_params=pltpu.CompilerParams(
            dimension_semantics=("parallel",)),
    )(xp, w0b, b0b, w1b, b1b, w2b, b2b)

    # Free contiguous reshape back to per-row outputs, drop any p-padding rows.
    return out_packed.reshape(n_rows, d_out)[:N]


def init_mlp_readout_params(input_dim, output_dim, L=2, seed_val=789,
                            dtype=jnp.float32):
    """Deterministic init matching the PyTorch module's layer shapes.

    Layer l (l < L): Linear(input_dim // 2**l -> input_dim // 2**(l+1))
    Layer L:         Linear(input_dim // 2**L -> output_dim)
    U(-1/sqrt(fan_in), 1/sqrt(fan_in)), PyTorch-default-like.
    """
    key = jax.random.PRNGKey(seed_val)
    dims = [input_dim // (2 ** l) for l in range(L + 1)] + [output_dim]
    params = []
    for l in range(L + 1):
        fan_in, fan_out = dims[l], dims[l + 1]
        key, kw, kb = jax.random.split(key, 3)
        bound = 1.0 / (fan_in ** 0.5)
        w = jax.random.uniform(kw, (fan_in, fan_out), dtype,
                               minval=-bound, maxval=bound)
        b = jax.random.uniform(kb, (1, fan_out), dtype,
                               minval=-bound, maxval=bound)
        params.append((w, b))
    return tuple(params)


def mlp_readout_ref(x, params):
    """Pure-JAX reference of the PyTorch forward."""
    (w0, b0), (w1, b1), (w2, b2) = params
    y = jnp.maximum(x @ w0 + b0, 0.0)
    y = jnp.maximum(y @ w1 + b1, 0.0)
    return y @ w2 + b2


if __name__ == "__main__":
    input_dim, output_dim = 32, 4
    params = init_mlp_readout_params(input_dim, output_dim, L=2, seed_val=789)

    key = jax.random.PRNGKey(0)
    k1, k2, k3 = jax.random.split(key, 3)

    # Small, lane-pack-aligned batch.
    x = jax.random.normal(k1, (8, input_dim), dtype=jnp.float32)
    out = jax.block_until_ready(mlp_readout(x, params))
    ref = mlp_readout_ref(x, params)
    assert out.shape == (8, output_dim)
    assert jnp.allclose(out, ref, atol=1e-4, rtol=1e-4), "mismatch (aligned)"

    # Ragged batch (not a multiple of the tile / chunk) -> partial last block.
    x2 = jax.random.normal(k2, (200, input_dim), dtype=jnp.float32)
    out2 = jax.block_until_ready(mlp_readout(x2, params))
    ref2 = mlp_readout_ref(x2, params)
    assert out2.shape == (200, output_dim)
    assert jnp.allclose(out2, ref2, atol=1e-4, rtol=1e-4), "mismatch (ragged)"

    # Batch not divisible by the lane-packing factor (exercises the tiny pad).
    x3 = jax.random.normal(k3, (7, input_dim), dtype=jnp.float32)
    out3 = jax.block_until_ready(mlp_readout(x3, params))
    ref3 = mlp_readout_ref(x3, params)
    assert out3.shape == (7, output_dim)
    assert jnp.allclose(out3, ref3, atol=1e-4, rtol=1e-4), "mismatch (unaligned)"

    print("KERNEL_OK")
</pallas_src>

<mosaic_0001>
module attributes {stable_mosaic.version = 11 : i64} {
  func.func @_mlp_readout_kernel(%arg0: i32, %arg1: memref<128x128xf32, #tpu.memory_space<vmem>>, %arg2: memref<128x64xf32, #tpu.memory_space<vmem>>, %arg3: memref<1x64xf32, #tpu.memory_space<vmem>>, %arg4: memref<64x32xf32, #tpu.memory_space<vmem>>, %arg5: memref<1x32xf32, #tpu.memory_space<vmem>>, %arg6: memref<32x16xf32, #tpu.memory_space<vmem>>, %arg7: memref<1x16xf32, #tpu.memory_space<vmem>>, %arg8: memref<128x16xf32, #tpu.memory_space<vmem>>) attributes {dimension_semantics = [#tpu.dimension_semantics<parallel>], iteration_bounds = array<i64: 1>, scalar_prefetch = 0 : i64, scratch_operands = 0 : i64, tpu.core_type = #tpu.core_type<tc>, window_params = [{transform_indices = @transform_0, window_bounds = array<i64: 128, 128>}, {pipeline_mode = #tpu.pipeline_mode<synchronous>, transform_indices = @transform_1, window_bounds = array<i64: 128, 64>}, {pipeline_mode = #tpu.pipeline_mode<synchronous>, transform_indices = @transform_2, window_bounds = array<i64: 1, 64>}, {pipeline_mode = #tpu.pipeline_mode<synchronous>, transform_indices = @transform_3, window_bounds = array<i64: 64, 32>}, {pipeline_mode = #tpu.pipeline_mode<synchronous>, transform_indices = @transform_4, window_bounds = array<i64: 1, 32>}, {pipeline_mode = #tpu.pipeline_mode<synchronous>, transform_indices = @transform_5, window_bounds = array<i64: 32, 16>}, {pipeline_mode = #tpu.pipeline_mode<synchronous>, transform_indices = @transform_6, window_bounds = array<i64: 1, 16>}, {transform_indices = @transform_7, window_bounds = array<i64: 128, 16>}]} {
    %c0 = arith.constant 0 : index
    %c0_0 = arith.constant 0 : index
    %0 = vector.load %arg2[%c0, %c0_0] : memref<128x64xf32, #tpu.memory_space<vmem>>, vector<128x64xf32>
    %c0_1 = arith.constant 0 : index
    %c0_2 = arith.constant 0 : index
    %1 = vector.load %arg3[%c0_1, %c0_2] : memref<1x64xf32, #tpu.memory_space<vmem>>, vector<1x64xf32>
    %c0_3 = arith.constant 0 : index
    %c0_4 = arith.constant 0 : index
    %2 = vector.load %arg4[%c0_3, %c0_4] : memref<64x32xf32, #tpu.memory_space<vmem>>, vector<64x32xf32>
    %c0_5 = arith.constant 0 : index
    %c0_6 = arith.constant 0 : index
    %3 = vector.load %arg5[%c0_5, %c0_6] : memref<1x32xf32, #tpu.memory_space<vmem>>, vector<1x32xf32>
    %c0_7 = arith.constant 0 : index
    %c0_8 = arith.constant 0 : index
    %4 = vector.load %arg6[%c0_7, %c0_8] : memref<32x16xf32, #tpu.memory_space<vmem>>, vector<32x16xf32>
    %c0_9 = arith.constant 0 : index
    %c0_10 = arith.constant 0 : index
    %5 = vector.load %arg7[%c0_9, %c0_10] : memref<1x16xf32, #tpu.memory_space<vmem>>, vector<1x16xf32>
    %c0_i32 = arith.constant 0 : i32
    %c128_i32 = arith.constant 128 : i32
    %6 = arith.muli %c0_i32, %c128_i32 : i32
    %7 = tpu.assume_multiple %6, 128 : i32
    %8 = arith.index_cast %7 : i32 to index
    %c0_11 = arith.constant 0 : index
    %9 = vector.load %arg1[%8, %c0_11] : memref<128x128xf32, #tpu.memory_space<vmem>>, vector<128x128xf32>
    %cst = arith.constant dense<0.000000e+00> : vector<128x64xf32>
    %10 = tpu.matmul %9, %0, %cst {dimension_numbers = #tpu.dot_dimension_numbers<[1], [0], [0], [1], [0, 0, 1, 1], [], []>} : vector<128x128xf32>, vector<128x64xf32>, vector<128x64xf32> -> vector<128x64xf32>
    %11 = vector.broadcast %1 : vector<1x64xf32> to vector<128x64xf32>
    %12 = arith.addf %10, %11 : vector<128x64xf32>
    %cst_12 = arith.constant 0.000000e+00 : f32
    %13 = vector.broadcast %cst_12 : f32 to vector<128x64xf32>
    %14 = arith.maximumf %12, %13 : vector<128x64xf32>
    %cst_13 = arith.constant dense<0.000000e+00> : vector<128x32xf32>
    %15 = tpu.matmul %14, %2, %cst_13 {dimension_numbers = #tpu.dot_dimension_numbers<[1], [0], [0], [1], [0, 0, 1, 1], [], []>} : vector<128x64xf32>, vector<64x32xf32>, vector<128x32xf32> -> vector<128x32xf32>
    %16 = vector.broadcast %3 : vector<1x32xf32> to vector<128x32xf32>
    %17 = arith.addf %15, %16 : vector<128x32xf32>
    %cst_14 = arith.constant 0.000000e+00 : f32
    %18 = vector.broadcast %cst_14 : f32 to vector<128x32xf32>
    %19 = arith.maximumf %17, %18 : vector<128x32xf32>
    %cst_15 = arith.constant dense<0.000000e+00> : vector<128x16xf32>
    %20 = tpu.matmul %19, %4, %cst_15 {dimension_numbers = #tpu.dot_dimension_numbers<[1], [0], [0], [1], [0, 0, 1, 1], [], []>} : vector<128x32xf32>, vector<32x16xf32>, vector<128x16xf32> -> vector<128x16xf32>
    %21 = vector.broadcast %5 : vector<1x16xf32> to vector<128x16xf32>
    %22 = arith.addf %20, %21 : vector<128x16xf32>
    %23 = arith.index_cast %7 : i32 to index
    %c0_16 = arith.constant 0 : index
    %24 = vector.load %arg8[%23, %c0_16] : memref<128x16xf32, #tpu.memory_space<vmem>>, vector<128x16xf32>
    tpu.vector_store %arg8[%23, %c0_16], %22 {strides = array<i32>} : memref<128x16xf32, #tpu.memory_space<vmem>>, vector<128x16xf32>,
    %c1_i32 = arith.constant 1 : i32
    return
  }
  func.func @transform_0(%arg0: i32) -> (i32, i32) {
    %c0_i32 = arith.constant 0 : i32
    %c0_i32_0 = arith.constant 0 : i32
    return %arg0, %c0_i32 : i32, i32
  }
  func.func @transform_1(%arg0: i32) -> (i32, i32) {
    %c0_i32 = arith.constant 0 : i32
    %c0_i32_0 = arith.constant 0 : i32
    %c0_i32_1 = arith.constant 0 : i32
    return %c0_i32, %c0_i32_0 : i32, i32
  }
  func.func @transform_2(%arg0: i32) -> (i32, i32) {
    %c0_i32 = arith.constant 0 : i32
    %c0_i32_0 = arith.constant 0 : i32
    %c0_i32_1 = arith.constant 0 : i32
    return %c0_i32, %c0_i32_0 : i32, i32
  }
  func.func @transform_3(%arg0: i32) -> (i32, i32) {
    %c0_i32 = arith.constant 0 : i32
    %c0_i32_0 = arith.constant 0 : i32
    %c0_i32_1 = arith.constant 0 : i32
    return %c0_i32, %c0_i32_0 : i32, i32
  }
  func.func @transform_4(%arg0: i32) -> (i32, i32) {
    %c0_i32 = arith.constant 0 : i32
    %c0_i32_0 = arith.constant 0 : i32
    %c0_i32_1 = arith.constant 0 : i32
    return %c0_i32, %c0_i32_0 : i32, i32
  }
  func.func @transform_5(%arg0: i32) -> (i32, i32) {
    %c0_i32 = arith.constant 0 : i32
    %c0_i32_0 = arith.constant 0 : i32
    %c0_i32_1 = arith.constant 0 : i32
    return %c0_i32, %c0_i32_0 : i32, i32
  }
  func.func @transform_6(%arg0: i32) -> (i32, i32) {
    %c0_i32 = arith.constant 0 : i32
    %c0_i32_0 = arith.constant 0 : i32
    %c0_i32_1 = arith.constant 0 : i32
    return %c0_i32, %c0_i32_0 : i32, i32
  }
  func.func @transform_7(%arg0: i32) -> (i32, i32) {
    %c0_i32 = arith.constant 0 : i32
    %c0_i32_0 = arith.constant 0 : i32
    return %arg0, %c0_i32 : i32, i32
  }
}

</mosaic_0001>

<bundles_post_ra>
// kernel: tpu_custom_call.1
= control target key start
LH: loop header
LB: loop body
LE: loop exit
PB: predicated region body
PF: predicated region fallthrough
CT: control target
= control target key end

     0   :  { %12 = vsyncpa [#allocation3], 0  ;;  %vm247_vm0 = vcmask 523264   ;;  %vm463_vm1 = vcmask 261120   ;;  %vm657_vm2 = vcmask 130048   ;;  %s1223_s0 = inlined_call_operand.vmem [shape: f32[2,128], index: 0, kind: input, shape index: {}]   ;;  %s1224_s1 = inlined_call_operand.vmem [shape: f32[128,64], index: 1, kind: input, shape index: {}]   ;;  %s1225_s2 = inlined_call_operand.vmem [shape: f32[1,64], index: 2, kind: input, shape index: {}]   ;;  %s1226_s3 = inlined_call_operand.vmem [shape: f32[64,32], index: 3, kind: input, shape index: {}]   ;;  %s1227_s4 = inlined_call_operand.vmem [shape: f32[1,32], index: 4, kind: input, shape index: {}]   ;;  %s1228_s5 = inlined_call_operand.vmem [shape: f32[32,16], index: 5, kind: input, shape index: {}]   ;;  %s1229_s6 = inlined_call_operand.vmem [shape: f32[1,16], index: 6, kind: input, shape index: {}]   ;;  %s1230_s7 = inlined_call_operand.hbm [shape: f32[2,16], index: 7, kind: output, shape index: {}]  }
   0x1   :  { %v42_v0 = vld [vmem:[%s1224_s1 + $0x78] sm:$0xff]  ;;  %v41_v1 = vld [vmem:[%s1224_s1 + $0x70] sm:$0xff]  ;;  %v40_v2 = vld [vmem:[%s1224_s1 + $0x68] sm:$0xff] }
   0x2   :  { %801 = vmatprep.subr.mxu0 %v42_v0  ;;  %v39_v3 = vld [vmem:[%s1224_s1 + $0x60] sm:$0xff]  ;;  %v38_v5 = vld [vmem:[%s1224_s1 + $0x58] sm:$0xff]  ;;  %v37_v6 = vld [vmem:[%s1224_s1 + $0x50] sm:$0xff] }
   0x3   :  { %802 = vmatpush3.msra.mxu0 %v42_v0  ;;  %v58_v4 = vld [vmem:[%s1223_s0] sm:$0xff]  ;;  %v36_v7 = vld [vmem:[%s1224_s1 + $0x48] sm:$0xff]  ;;  %v51_v8 = vld [vmem:[%s1226_s3 + $0x38] sm:$0xff] }
   0x4   :  { %803 = vmatprep.subr.mxu0 %v41_v1  ;;  %833 = vmatprep.mubr.f32.mxu0 %v58_v4  ;;  %v35_v9 = vld [vmem:[%s1224_s1 + $0x40] sm:$0xff]  ;;  %v50_v10 = vld [vmem:[%s1226_s3 + $0x30] sm:$0xff]  ;;  %v34_v11 = vld [vmem:[%s1224_s1 + $0x38] sm:$0xff] }
   0x5   :  { %804 = vmatpush3.msra.mxu0 %v41_v1  ;;  %929 = vmatprep.subr.mxu1 %v51_v8  ;;  %v49_v12 = vld [vmem:[%s1226_s3 + $0x28] sm:$0xff]  ;;  %v33_v13 = vld [vmem:[%s1224_s1 + $0x30] sm:$0xff]  ;;  %v48_v14 = vld [vmem:[%s1226_s3 + $0x20] sm:$0xff] }
   0x6   :  { %805 = vmatprep.subr.mxu0 %v40_v2  ;;  %937 = vmatpush3.msra.mxu1 %v51_v8  ;;  %v32_v15 = vld [vmem:[%s1224_s1 + $0x28] sm:$0xff]  ;;  %v47_v16 = vld [vmem:[%s1226_s3 + $0x18] sm:$0xff]  ;;  %v31_v17 = vld [vmem:[%s1224_s1 + $0x20] sm:$0xff] }
   0x7   :  { %806 = vmatpush3.msra.mxu0 %v40_v2  ;;  %930 = vmatprep.subr.mxu1 %v50_v10  ;;  %v46_v18 = vld [vmem:[%s1226_s3 + $0x10] sm:$0xff]  ;;  %v30_v19 = vld [vmem:[%s1224_s1 + $0x18] sm:$0xff]  ;;  %v45_v20 = vld [vmem:[%s1226_s3 + $0x8] sm:$0xff] }
   0x8   :  { %807 = vmatprep.subr.mxu0 %v39_v3  ;;  %938 = vmatpush3.msra.mxu1 %v50_v10  ;;  %v29_v21 = vld [vmem:[%s1224_s1 + $0x10] sm:$0xff]  ;;  %v28_v22 = vld [vmem:[%s1224_s1 + $0x8] sm:$0xff]  ;;  %v27_v23 = vld [vmem:[%s1224_s1] sm:$0xff] }
   0x9   :  { %808 = vmatpush3.msra.mxu0 %v39_v3  ;;  %931 = vmatprep.subr.mxu1 %v49_v12  ;;  %v59_v24 = vld [vmem:[%s1223_s0 + $0x8] sm:$0xff]  ;;  %v60_v25 = vld [vmem:[%s1223_s0 + $0x10] sm:$0xff]  ;;  %v61_v26 = vld [vmem:[%s1223_s0 + $0x18] sm:$0xff] }
   0xa   :  { %809 = vmatprep.subr.mxu0 %v38_v5  ;;  %939 = vmatpush3.msra.mxu1 %v49_v12  ;;  %v62_v27 = vld [vmem:[%s1223_s0 + $0x20] sm:$0xff]  ;;  %v63_v28 = vld [vmem:[%s1223_s0 + $0x28] sm:$0xff]  ;;  %v64_v29 = vld [vmem:[%s1223_s0 + $0x30] sm:$0xff] }
   0xb   :  { %810 = vmatpush3.msra.mxu0 %v38_v5  ;;  %932 = vmatprep.subr.mxu1 %v48_v14  ;;  %v65_v30 = vld [vmem:[%s1223_s0 + $0x38] sm:$0xff]  ;;  %v66_v31 = vld [vmem:[%s1223_s0 + $0x40] sm:$0xff]  ;;  %v67_v32 = vld [vmem:[%s1223_s0 + $0x48] sm:$0xff] }
   0xc   :  { %811 = vmatprep.subr.mxu0 %v37_v6  ;;  %940 = vmatpush3.msra.mxu1 %v48_v14  ;;  %v68_v33 = vld [vmem:[%s1223_s0 + $0x50] sm:$0xff]  ;;  %v69_v34 = vld [vmem:[%s1223_s0 + $0x58] sm:$0xff]  ;;  %v70_v35 = vld [vmem:[%s1223_s0 + $0x60] sm:$0xff] }
   0xd   :  { %812 = vmatpush3.msra.mxu0 %v37_v6  ;;  %933 = vmatprep.subr.mxu1 %v47_v16  ;;  %v71_v36 = vld [vmem:[%s1223_s0 + $0x68] sm:$0xff]  ;;  %v72_v37 = vld [vmem:[%s1223_s0 + $0x70] sm:$0xff]  ;;  %v73_v38 = vld [vmem:[%s1223_s0 + $0x78] sm:$0xff] }
   0xe   :  { %813 = vmatprep.subr.mxu0 %v36_v7  ;;  %941 = vmatpush3.msra.mxu1 %v47_v16  ;;  %v44_v39 = vld [vmem:[%s1226_s3] sm:$0xff]  ;;  %v56_v40 = vld [vmem:[%s1228_s5 + $0x18] sm:$0xff]  ;;  %v55_v0 = vld [vmem:[%s1228_s5 + $0x10] sm:$0xff] }
   0xf   :  { %814 = vmatpush3.msra.mxu0 %v36_v7  ;;  %934 = vmatprep.subr.mxu1 %v46_v18  ;;  %v1139_v41 = vld [vmem:[%s1225_s2] ss:$0 sm:$0xff]  ;;  %v54_v3 = vld [vmem:[%s1228_s5 + $0x8] sm:$0xff] }
  0x10   :  { %815 = vmatprep.subr.mxu0 %v35_v9  ;;  %942 = vmatpush3.msra.mxu1 %v46_v18 }
  0x11   :  { %816 = vmatpush3.msra.mxu0 %v35_v9  ;;  %935 = vmatprep.subr.mxu1 %v45_v20 }
  0x12   :  { %817 = vmatprep.subr.mxu0 %v34_v11  ;;  %943 = vmatpush3.msra.mxu1 %v45_v20 }
  0x13   :  { %818 = vmatpush3.msra.mxu0 %v34_v11  ;;  %936 = vmatprep.subr.mxu1 %v44_v39 }
  0x14   :  { %819 = vmatprep.subr.mxu0 %v33_v13  ;;  %944 = vmatpush3.msra.mxu1 %v44_v39 }
  0x15   :  { %820 = vmatpush3.msra.mxu0 %v33_v13  ;;  %897 = vmatprep.subr.mxu1 %v56_v40 }
  0x16   :  { %821 = vmatprep.subr.mxu0 %v32_v15 }
  0x17   :  { %822 = vmatpush3.msra.mxu0 %v32_v15 }
  0x18   :  { %823 = vmatprep.subr.mxu0 %v31_v17 }
  0x19   :  { %824 = vmatpush3.msra.mxu0 %v31_v17 }
  0x1a   :  { %825 = vmatprep.subr.mxu0 %v30_v19 }
  0x1b   :  { %826 = vmatpush3.msra.mxu0 %v30_v19 }
  0x1c   :  { %827 = vmatprep.subr.mxu0 %v29_v21 }
  0x1d   :  { %828 = vmatpush3.msra.mxu0 %v29_v21 }
  0x1e   :  { %829 = vmatprep.subr.mxu0 %v28_v22 }
  0x1f   :  { %830 = vmatpush3.msra.mxu0 %v28_v22 }
  0x20   :  { %831 = vmatprep.subr.mxu0 %v27_v23 }
  0x21   :  { %832 = vmatpush3.msra.mxu0 %v27_v23 }
  0x22   :  { %834 = vmatmul.mubr.f32.vlgmr.msra.gmra.mxu0 %v59_v24  ;;  %857 = vmatprep.subr.mxu0 %v51_v8 }
  0x23   :  { %836 = vmatprep.mubr.f32.mxu0 %v60_v25  ;;  %858 = vmatpush3.msra.mxu0 %v51_v8 }
  0x24   :  { %859 = vmatprep.subr.mxu0 %v50_v10 }
  0x25   :  { %860 = vmatpush3.msra.mxu0 %v50_v10 }
  0x26   :  { %837 = vmatmul.mubr.f32.gmra.mxu0 %v61_v26  ;;  %861 = vmatprep.subr.mxu0 %v49_v12 }
  0x27   :  { %839 = vmatprep.mubr.f32.mxu0 %v62_v27  ;;  %862 = vmatpush3.msra.mxu0 %v49_v12 }
  0x28   :  { %863 = vmatprep.subr.mxu0 %v48_v14 }
  0x29   :  { %864 = vmatpush3.msra.mxu0 %v48_v14 }
  0x2a   :  { %840 = vmatmul.mubr.f32.gmra.mxu0 %v63_v28  ;;  %865 = vmatprep.subr.mxu0 %v47_v16  ;;  %v53_v28 = vld [vmem:[%s1228_s5] sm:$0xff] }
  0x2b   :  { %842 = vmatprep.mubr.f32.mxu0 %v64_v29  ;;  %866 = vmatpush3.msra.mxu0 %v47_v16  ;;  %v691_v29 = vld [vmem:[%s1227_s4] ss:$0 sm:$0xff] }
  0x2c   :  { %867 = vmatprep.subr.mxu0 %v46_v18 }
  0x2d   :  { %868 = vmatpush3.msra.mxu0 %v46_v18 }
  0x2e   :  { %843 = vmatmul.mubr.f32.gmra.mxu0 %v65_v30  ;;  %869 = vmatprep.subr.mxu0 %v45_v20 }
  0x2f   :  { %845 = vmatprep.mubr.f32.mxu0 %v66_v31  ;;  %870 = vmatpush3.msra.mxu0 %v45_v20 }
  0x30   :  { %871 = vmatprep.subr.mxu0 %v44_v39 }
  0x31   :  { %872 = vmatpush3.msra.mxu0 %v44_v39 }
  0x32   :  { %846 = vmatmul.mubr.f32.gmra.mxu0 %v67_v32 }
  0x33   :  { %848 = vmatprep.mubr.f32.mxu0 %v68_v33 }
  0x36   :  { %849 = vmatmul.mubr.f32.gmra.mxu0 %v69_v34 }
  0x37   :  { %851 = vmatprep.mubr.f32.mxu0 %v70_v35 }
  0x3a   :  { %852 = vmatmul.mubr.f32.gmra.mxu0 %v71_v36 }
  0x3b   :  { %854 = vmatprep.mubr.f32.mxu0 %v72_v37 }
  0x3e   :  { %855 = vmatmul.mubr.f32.gmra.mxu0 %v73_v38 }
  0xe2   :  { %v835_v42 = vpop.f32.mrf.mxu0 }
  0xe3   :  { %v152_v43 = vadd.f32 %v835_v42, %v1139_v41 }
  0xe4   :  { %v146_v44 = vpop.f32.mrf.mxu0 }
  0xe5   :  { %v147_v45 = vadd.f32 %v1139_v41, %v146_v44  ;;  %v226_v48 = vmax.f32 %v152_v43, 0.0 }
  0xe6   :  { %v838_v46 = vpop.f32.mrf.mxu0 }
  0xe7   :  { %v225_v47 = vmax.f32 %v147_v45, 0.0  ;;  %v162_v49 = vadd.f32 %v838_v46, %v1139_v41 }
  0xe8   :  { %v156_v50 = vpop.f32.mrf.mxu0 }
  0xe9   :  { %v157_v51 = vadd.f32 %v1139_v41, %v156_v50  ;;  %873 = vmatprep.mubr.msk.f32.mxu0 %vm247_vm0, %v225_v47  ;;  %v228_v54 = vmax.f32 %v162_v49, 0.0 }
  0xea   :  { %v841_v52 = vpop.f32.mrf.mxu0  ;;  %874 = vmatmul.mubr.msk.f32.vlgmr.msra.gmra.mxu0 %vm247_vm0, %v226_v48 }
  0xeb   :  { %v227_v53 = vmax.f32 %v157_v51, 0.0  ;;  %v172_v55 = vadd.f32 %v841_v52, %v1139_v41 }
  0xec   :  { %v166_v56 = vpop.f32.mrf.mxu0 }
  0xed   :  { %v167_v57 = vadd.f32 %v1139_v41, %v166_v56  ;;  %876 = vmatprep.mubr.msk.f32.mxu0 %vm247_vm0, %v227_v53  ;;  %v230_v60 = vmax.f32 %v172_v55, 0.0 }
  0xee   :  { %v844_v58 = vpop.f32.mrf.mxu0  ;;  %877 = vmatmul.mubr.msk.f32.gmra.mxu0 %vm247_vm0, %v228_v54 }
  0xef   :  { %v229_v59 = vmax.f32 %v167_v57, 0.0  ;;  %v182_v61 = vadd.f32 %v844_v58, %v1139_v41 }
  0xf0   :  { %v176_v62 = vpop.f32.mrf.mxu0 }
  0xf1   :  { %v177_v63 = vadd.f32 %v1139_v41, %v176_v62  ;;  %879 = vmatprep.mubr.msk.f32.mxu1 %vm247_vm0, %v229_v59  ;;  %v232_v4 = vmax.f32 %v182_v61, 0.0 }
  0xf2   :  { %v847_v1 = vpop.f32.mrf.mxu0  ;;  %880 = vmatmul.mubr.msk.f32.vlgmr.msra.gmra.mxu1 %vm247_vm0, %v230_v60 }
  0xf3   :  { %v231_v2 = vmax.f32 %v177_v63, 0.0  ;;  %898 = vmatpush3.msra.mxu1 %v56_v40  ;;  %v192_v5 = vadd.f32 %v847_v1, %v1139_v41 }
  0xf4   :  { %v186_v6 = vpop.f32.mrf.mxu0  ;;  %899 = vmatprep.subr.mxu1 %v55_v0 }
  0xf5   :  { %v187_v7 = vadd.f32 %v1139_v41, %v186_v6  ;;  %882 = vmatprep.mubr.msk.f32.mxu1 %vm247_vm0, %v231_v2  ;;  %900 = vmatpush3.msra.mxu1 %v55_v0  ;;  %v234_v10 = vmax.f32 %v192_v5, 0.0 }
  0xf6   :  { %v850_v8 = vpop.f32.mrf.mxu0  ;;  %883 = vmatmul.mubr.msk.f32.gmra.mxu1 %vm247_vm0, %v232_v4  ;;  %901 = vmatprep.subr.mxu1 %v54_v3 }
  0xf7   :  { %v233_v9 = vmax.f32 %v187_v7, 0.0  ;;  %902 = vmatpush3.msra.mxu1 %v54_v3  ;;  %v202_v11 = vadd.f32 %v850_v8, %v1139_v41 }
  0xf8   :  { %v196_v12 = vpop.f32.mrf.mxu0  ;;  %903 = vmatprep.subr.mxu1 %v53_v28 }
  0xf9   :  { %v197_v13 = vadd.f32 %v1139_v41, %v196_v12  ;;  %885 = vmatprep.mubr.msk.f32.mxu1 %vm247_vm0, %v233_v9  ;;  %v236_v16 = vmax.f32 %v202_v11, 0.0  ;;  %904 = vmatpush3.msra.mxu1 %v53_v28 }
  0xfa   :  { %v853_v14 = vpop.f32.mrf.mxu0  ;;  %886 = vmatmul.mubr.msk.f32.gmra.mxu1 %vm247_vm0, %v234_v10 }
  0xfb   :  { %v235_v15 = vmax.f32 %v197_v13, 0.0  ;;  %v212_v17 = vadd.f32 %v853_v14, %v1139_v41  ;;  %v708_v14 = vld [vmem:[%s1229_s6] ss:$0 sm:$0xff] }
  0xfc   :  { %v206_v18 = vpop.f32.mrf.mxu0 }
  0xfd   :  { %v207_v19 = vadd.f32 %v1139_v41, %v206_v18  ;;  %888 = vmatprep.mubr.msk.f32.mxu1 %vm247_vm0, %v235_v15  ;;  %v238_v22 = vmax.f32 %v212_v17, 0.0 }
  0xfe   :  { %v856_v20 = vpop.f32.mrf.mxu0  ;;  %889 = vmatmul.mubr.msk.f32.gmra.mxu1 %vm247_vm0, %v236_v16 }
  0xff   :  { %v237_v21 = vmax.f32 %v207_v19, 0.0  ;;  %v222_v23 = vadd.f32 %v856_v20, %v1139_v41 }
 0x100   :  { %v216_v24 = vpop.f32.mrf.mxu0 }
 0x101   :  { %v217_v25 = vadd.f32 %v1139_v41, %v216_v24  ;;  %891 = vmatprep.mubr.msk.f32.mxu1 %vm247_vm0, %v237_v21  ;;  %v240_v27 = vmax.f32 %v222_v23, 0.0 }
 0x102   :  { %892 = vmatmul.mubr.msk.f32.gmra.mxu1 %vm247_vm0, %v238_v22 }
 0x103   :  { %v239_v26 = vmax.f32 %v217_v25, 0.0 }
 0x105   :  { %894 = vmatprep.mubr.msk.f32.mxu1 %vm247_vm0, %v239_v26 }
 0x106   :  { %895 = vmatmul.mubr.msk.f32.gmra.mxu1 %vm247_vm0, %v240_v27 }
 0x1aa   :  { %v875_v30 = vpop.f32.mrf.mxu0 }
 0x1ab   :  { %v368_v31 = vadd.f32 %v875_v30, %v691_v29 }
 0x1ac   :  { %v362_v32 = vpop.f32.mrf.mxu0 }
 0x1ad   :  { %v363_v33 = vadd.f32 %v691_v29, %v362_v32  ;;  %v442_v36 = vmax.f32 %v368_v31, 0.0 }
 0x1ae   :  { %v878_v34 = vpop.f32.mrf.mxu0 }
 0x1af   :  { %v441_v35 = vmax.f32 %v363_v33, 0.0  ;;  %v378_v37 = vadd.f32 %v878_v34, %v691_v29 }
 0x1b0   :  { %v372_v38 = vpop.f32.mrf.mxu0 }
 0x1b1   :  { %v373_v39 = vadd.f32 %v691_v29, %v372_v38  ;;  %905 = vmatprep.mubr.msk.f32.mxu1 %vm463_vm1, %v441_v35  ;;  %v444_v42 = vmax.f32 %v378_v37, 0.0 }
 0x1b2   :  { %v881_v40 = vpop.f32.mrf.mxu1  ;;  %906 = vmatmul.mubr.msk.f32.vlgmr.msra.gmra.mxu1 %vm463_vm1, %v442_v36 }
 0x1b3   :  { %v443_v41 = vmax.f32 %v373_v39, 0.0  ;;  %v388_v43 = vadd.f32 %v881_v40, %v691_v29 }
 0x1b4   :  { %v382_v44 = vpop.f32.mrf.mxu1 }
 0x1b5   :  { %v383_v45 = vadd.f32 %v691_v29, %v382_v44  ;;  %908 = vmatprep.mubr.msk.f32.mxu1 %vm463_vm1, %v443_v41  ;;  %v446_v48 = vmax.f32 %v388_v43, 0.0 }
 0x1b6   :  { %v884_v46 = vpop.f32.mrf.mxu1  ;;  %909 = vmatmul.mubr.msk.f32.gmra.mxu1 %vm463_vm1, %v444_v42 }
 0x1b7   :  { %v445_v47 = vmax.f32 %v383_v45, 0.0  ;;  %v398_v49 = vadd.f32 %v884_v46, %v691_v29 }
 0x1b8   :  { %v392_v50 = vpop.f32.mrf.mxu1 }
 0x1b9   :  { %v393_v51 = vadd.f32 %v691_v29, %v392_v50  ;;  %911 = vmatprep.mubr.msk.f32.mxu1 %vm463_vm1, %v445_v47  ;;  %v448_v54 = vmax.f32 %v398_v49, 0.0 }
 0x1ba   :  { %v887_v52 = vpop.f32.mrf.mxu1  ;;  %912 = vmatmul.mubr.msk.f32.gmra.mxu1 %vm463_vm1, %v446_v48 }
 0x1bb   :  { %v447_v53 = vmax.f32 %v393_v51, 0.0  ;;  %v408_v55 = vadd.f32 %v887_v52, %v691_v29 }
 0x1bc   :  { %v402_v56 = vpop.f32.mrf.mxu1 }
 0x1bd   :  { %v403_v57 = vadd.f32 %v691_v29, %v402_v56  ;;  %914 = vmatprep.mubr.msk.f32.mxu1 %vm463_vm1, %v447_v53  ;;  %v450_v60 = vmax.f32 %v408_v55, 0.0 }
 0x1be   :  { %v890_v58 = vpop.f32.mrf.mxu1  ;;  %915 = vmatmul.mubr.msk.f32.gmra.mxu1 %vm463_vm1, %v448_v54 }
 0x1bf   :  { %v449_v59 = vmax.f32 %v403_v57, 0.0  ;;  %v418_v61 = vadd.f32 %v890_v58, %v691_v29 }
 0x1c0   :  { %v412_v62 = vpop.f32.mrf.mxu1 }
 0x1c1   :  { %v413_v63 = vadd.f32 %v691_v29, %v412_v62  ;;  %917 = vmatprep.mubr.msk.f32.mxu1 %vm463_vm1, %v449_v59  ;;  %v452_v2 = vmax.f32 %v418_v61, 0.0 }
 0x1c2   :  { %v893_v0 = vpop.f32.mrf.mxu1  ;;  %918 = vmatmul.mubr.msk.f32.gmra.mxu1 %vm463_vm1, %v450_v60 }
 0x1c3   :  { %v451_v1 = vmax.f32 %v413_v63, 0.0  ;;  %v428_v3 = vadd.f32 %v893_v0, %v691_v29 }
 0x1c4   :  { %v422_v4 = vpop.f32.mrf.mxu1 }
 0x1c5   :  { %v423_v5 = vadd.f32 %v691_v29, %v422_v4  ;;  %920 = vmatprep.mubr.msk.f32.mxu1 %vm463_vm1, %v451_v1  ;;  %v454_v8 = vmax.f32 %v428_v3, 0.0 }
 0x1c6   :  { %v896_v6 = vpop.f32.mrf.mxu1  ;;  %921 = vmatmul.mubr.msk.f32.gmra.mxu1 %vm463_vm1, %v452_v2 }
 0x1c7   :  { %v453_v7 = vmax.f32 %v423_v5, 0.0  ;;  %v438_v9 = vadd.f32 %v896_v6, %v691_v29 }
 0x1c8   :  { %v432_v10 = vpop.f32.mrf.mxu1 }
 0x1c9   :  { %v433_v11 = vadd.f32 %v691_v29, %v432_v10  ;;  %923 = vmatprep.mubr.msk.f32.mxu1 %vm463_vm1, %v453_v7  ;;  %v456_v13 = vmax.f32 %v438_v9, 0.0 }
 0x1ca   :  { %924 = vmatmul.mubr.msk.f32.gmra.mxu1 %vm463_vm1, %v454_v8 }
 0x1cb   :  { %v455_v12 = vmax.f32 %v433_v11, 0.0 }
 0x1cd   :  { %926 = vmatprep.mubr.msk.f32.mxu1 %vm463_vm1, %v455_v12 }
 0x1ce   :  { %927 = vmatmul.mubr.msk.f32.gmra.mxu1 %vm463_vm1, %v456_v13 }
 0x272   :  { %v907_v15 = vpop.f32.mrf.mxu1 }
 0x273   :  { %v584_v16 = vadd.f32 %v907_v15, %v708_v14 }
 0x274   :  { %v578_v17 = vpop.f32.mrf.mxu1 }
 0x275   :  { %659 = vst.msk [vmem:[#allocation2 + $0x8] sm:$0xff] %vm657_vm2, %v584_v16  ;;  %v579_v18 = vadd.f32 %v708_v14, %v578_v17 }
 0x276   :  { %v910_v19 = vpop.f32.mrf.mxu1 }
 0x277   :  { %658 = vst.msk [vmem:[#allocation2] sm:$0xff] %vm657_vm2, %v579_v18  ;;  %v594_v20 = vadd.f32 %v910_v19, %v708_v14 }
 0x278   :  { %v588_v21 = vpop.f32.mrf.mxu1 }
 0x279   :  { %661 = vst.msk [vmem:[#allocation2 + $0x18] sm:$0xff] %vm657_vm2, %v594_v20  ;;  %v589_v22 = vadd.f32 %v708_v14, %v588_v21 }
 0x27a   :  { %v913_v23 = vpop.f32.mrf.mxu1 }
 0x27b   :  { %660 = vst.msk [vmem:[#allocation2 + $0x10] sm:$0xff] %vm657_vm2, %v589_v22  ;;  %v604_v24 = vadd.f32 %v913_v23, %v708_v14 }
 0x27c   :  { %v598_v25 = vpop.f32.mrf.mxu1 }
 0x27d   :  { %663 = vst.msk [vmem:[#allocation2 + $0x28] sm:$0xff] %vm657_vm2, %v604_v24  ;;  %v599_v26 = vadd.f32 %v708_v14, %v598_v25 }
 0x27e   :  { %v916_v27 = vpop.f32.mrf.mxu1 }
 0x27f   :  { %662 = vst.msk [vmem:[#allocation2 + $0x20] sm:$0xff] %vm657_vm2, %v599_v26  ;;  %v614_v28 = vadd.f32 %v916_v27, %v708_v14 }
 0x280   :  { %v608_v29 = vpop.f32.mrf.mxu1 }
 0x281   :  { %665 = vst.msk [vmem:[#allocation2 + $0x38] sm:$0xff] %vm657_vm2, %v614_v28  ;;  %v609_v30 = vadd.f32 %v708_v14, %v608_v29 }
 0x282   :  { %v919_v31 = vpop.f32.mrf.mxu1 }
 0x283   :  { %664 = vst.msk [vmem:[#allocation2 + $0x30] sm:$0xff] %vm657_vm2, %v609_v30  ;;  %v624_v32 = vadd.f32 %v919_v31, %v708_v14 }
 0x284   :  { %v618_v33 = vpop.f32.mrf.mxu1 }
 0x285   :  { %667 = vst.msk [vmem:[#allocation2 + $0x48] sm:$0xff] %vm657_vm2, %v624_v32  ;;  %v619_v34 = vadd.f32 %v708_v14, %v618_v33 }
 0x286   :  { %v922_v35 = vpop.f32.mrf.mxu1 }
 0x287   :  { %666 = vst.msk [vmem:[#allocation2 + $0x40] sm:$0xff] %vm657_vm2, %v619_v34  ;;  %v634_v36 = vadd.f32 %v922_v35, %v708_v14 }
 0x288   :  { %v628_v37 = vpop.f32.mrf.mxu1 }
 0x289   :  { %669 = vst.msk [vmem:[#allocation2 + $0x58] sm:$0xff] %vm657_vm2, %v634_v36  ;;  %v629_v38 = vadd.f32 %v708_v14, %v628_v37 }
 0x28a   :  { %v925_v39 = vpop.f32.mrf.mxu1 }
 0x28b   :  { %668 = vst.msk [vmem:[#allocation2 + $0x50] sm:$0xff] %vm657_vm2, %v629_v38  ;;  %v644_v40 = vadd.f32 %v925_v39, %v708_v14 }
 0x28c   :  { %v638_v41 = vpop.f32.mrf.mxu1 }
 0x28d   :  { %671 = vst.msk [vmem:[#allocation2 + $0x68] sm:$0xff] %vm657_vm2, %v644_v40  ;;  %v639_v42 = vadd.f32 %v708_v14, %v638_v41 }
 0x28e   :  { %v928_v43 = vpop.f32.mrf.mxu1 }
 0x28f   :  { %670 = vst.msk [vmem:[#allocation2 + $0x60] sm:$0xff] %vm657_vm2, %v639_v42  ;;  %v654_v44 = vadd.f32 %v928_v43, %v708_v14 }
 0x290   :  { %v648_v45 = vpop.f32.mrf.mxu1 }
 0x291   :  { %673 = vst.msk [vmem:[#allocation2 + $0x78] sm:$0xff] %vm657_vm2, %v654_v44  ;;  %v649_v46 = vadd.f32 %v708_v14, %v648_v45 }
 0x293   :  { %672 = vst.msk [vmem:[#allocation2 + $0x70] sm:$0xff] %vm657_vm2, %v649_v46 }
 0x294   :  { %678 = vsyncadd [#allocation3], 2016  ;;  %s970_s6 = smov [#allocation2]  }
 0x295   :  { %s679_s19 = sshll.u32 %s970_s6, 4  ;;  %s680_s19 = int_to_ptr.vmem [resolvable:$true] %s679_s19 }
 0x296   :  { %s948_s20 = scalar_lea.vmem %s680_s19, 32  ;;  %s952_s21 = scalar_lea.vmem %s680_s19, 2048 }
 0x297   :  { %p949_p0 = scmp.ne.s32.totalorder %s680_s19, %s948_s20  ;;  %p953_p1 = scmp.lt.s32.totalorder %s680_s19, %s680_s19 }
 0x298   :  { %p954_p2 = scmp.lt.s32.totalorder %s952_s21, %s948_s20 }
 0x29a   :  { %p955_p3 = por %p954_p2, %p953_p1 }
 0x29c   :  { %p956_p4 = pnand %p955_p3, %p949_p0 }
 0x29e   :  { %959 = shalt.err (!%p956_p4)
}
 0x29f   :  { %s971_s22 = smov 32   ;;  %s972_s23 = smov 2  }
 0x2a0   :  { %685 = dma.vmem_to_hbm [thread:$0]  %s680_s19, 32, %s1230_s7, [#allocation3], %s971_s22, %s971_s22, %s972_s23  }
 0x2a1   :  { %968 = dma.done.wait [#allocation3], 2048  }
 0x2a2   :  { %969 = vsyncadd [#allocation3], 4294965248 }
 0x2a3   :  { %689 = vsyncpa [#allocation3], 1 }

</bundles_post_ra>
